<compile_context>
chip_gen: v7x
topology: tpu7x:2x2x1
jax: 0.10.0
libtpu: 0.0.40
codegen_flags: <defaults>
</compile_context>

<pallas_src>
import jax
import jax.numpy as jnp
from jax.experimental import pallas as pl
from jax.experimental.pallas import tpu as pltpu

SEQ_LEN = 27                  # fixed by the module (self.seq_len = 27)
KERNELS = (2, 3, 4, 5)        # conv / pool kernel sizes (stride 1)
TAP_OFFSETS = (0, 2, 5, 9)    # row offset of each branch inside the stacked taps
NUM_TAPS = sum(KERNELS)       # 14
OUT_PAD = 128                 # lane-dense output width


def _shift_left(v, k):
    """result[:, l] = v[:, l + k] (wrap-around). k is a static Python int."""
    if k == 0:
        return v
    return jnp.concatenate([v[:, k:], v[:, :k]], axis=1)


def _row(t, idx):
    """Extract t[:, idx, :] as a (bB, E) array.

    Implemented as a width-1 middle-axis reduction (a pattern known to lower
    in Mosaic) instead of an integer-index squeeze-reshape.
    """
    return jnp.sum(t[:, idx:idx + 1, :], axis=1)


def cnn_kernel(x_ref, wall_ref, wfc_ref, cb_ref, fcb_ref, out_ref):
    bb, _, _ = x_ref.shape
    n_pad = out_ref.shape[1]

    x = x_ref[...]                                   # (bB, 27, E) bf16
    wall = wall_ref[...]                             # (14, 27)    bf16

    # One MXU contraction over the 27 channels for all 14 taps / 4 branches.
    wb = jnp.broadcast_to(wall[None], (bb,) + wall.shape)       # (bB, 14, 27)
    t = jnp.einsum('btc,bce->bte', wb, x,
                   preferred_element_type=jnp.float32)          # (bB, 14, E) f32

    acc = jnp.zeros((bb, n_pad), jnp.float32)
    for i, (K, off) in enumerate(zip(KERNELS, TAP_OFFSETS)):
        # Conv1d(out_channels=1, kernel=K): sum of tap-shifted reduced rows.
        conv = _row(t, off)
        for k in range(1, K):
            conv = conv + _shift_left(_row(t, off + k), k)
        conv = jnp.maximum(conv + cb_ref[i], 0.0)               # bias (SMEM) + ReLU

        # MaxPool1d(K, stride=1): shifted running max. Columns >= Pout hold
        # wrapped garbage; they are killed by zero rows of the padded FC block.
        pooled = conv
        for j in range(1, K):
            pooled = jnp.maximum(pooled, _shift_left(conv, j))

        # Accumulating sub-dot replaces the ragged concat + one big FC dot.
        acc = acc + jnp.dot(pooled, wfc_ref[i],
                            preferred_element_type=jnp.float32)

    out_ref[...] = (acc + fcb_ref[...]).astype(out_ref.dtype)


def cnn_forward(tokens, emb_weight, conv_ws, conv_bs, fc_w, fc_b, *, block_b=128):
    """tokens: (B, 27) int32; emb_weight: (V, E); conv_ws[i]: (27, K_i);
    conv_bs[i]: scalar; fc_w: (num_labels, F) with F = sum_i (E - 2*(K_i-1));
    fc_b: (num_labels,). Returns (B, num_labels) float32."""
    # Glue: embedding gather, stored as bf16 (dominant HBM tensor).
    x = emb_weight[tokens].astype(jnp.bfloat16)                 # (B, 27, E)
    B, C, E = x.shape
    num_labels = int(fc_b.shape[0])
    assert C == SEQ_LEN and num_labels <= OUT_PAD

    # Stacked conv taps: row (offset_i + k) holds w_i[:, k].   (14, 27) bf16
    wall_t = jnp.concatenate([w.T for w in conv_ws], axis=0).astype(jnp.bfloat16)

    # Per-branch FC weight blocks padded to (E, 128): rows >= Pout_i and
    # columns >= num_labels are zero (this also masks the wrapped shift tail).
    fcw_t = fc_w.T.astype(jnp.float32)                          # (F, num_labels)
    wfc_blocks = []
    feat_off = 0
    for K in KERNELS:
        pout = E - 2 * (K - 1)
        blk = jnp.zeros((E, OUT_PAD), jnp.float32)
        blk = blk.at[:pout, :num_labels].set(fcw_t[feat_off:feat_off + pout, :])
        wfc_blocks.append(blk)
        feat_off += pout
    assert feat_off == fcw_t.shape[0]
    wfc = jnp.stack(wfc_blocks, axis=0)                         # (4, E, 128)

    cb = jnp.stack(conv_bs).astype(jnp.float32)                 # (4,) -> SMEM
    fcb = jnp.zeros((1, OUT_PAD), jnp.float32).at[0, :num_labels].set(
        fc_b.astype(jnp.float32))

    # Batch tiling (block_b should be a multiple of 8 for large B).
    bb = min(block_b, B)
    grid = (pl.cdiv(B, bb),)

    out_pad = pl.pallas_call(
        cnn_kernel,
        out_shape=jax.ShapeDtypeStruct((B, OUT_PAD), jnp.float32),
        grid=grid,
        in_specs=[
            pl.BlockSpec((bb, C, E), lambda i: (i, 0, 0)),              # x
            pl.BlockSpec((NUM_TAPS, C), lambda i: (0, 0)),              # stacked taps
            pl.BlockSpec((len(KERNELS), E, OUT_PAD),
                         lambda i: (0, 0, 0)),                          # padded FC
            pl.BlockSpec(memory_space=pltpu.MemorySpace.SMEM),          # conv biases
            pl.BlockSpec((1, OUT_PAD), lambda i: (0, 0)),               # fc bias row
        ],
        out_specs=pl.BlockSpec((bb, OUT_PAD), lambda i: (i, 0)),
        compiler_params=pltpu.CompilerParams(
            dimension_semantics=("parallel",),
            vmem_limit_bytes=48 * 1024 * 1024,
        ),
    )(x, wall_t, wfc, cb, fcb)

    return out_pad[:, :num_labels]


def cnn_reference(tokens, emb_weight, conv_ws, conv_bs, fc_w, fc_b):
    """Pure-JAX reference mirroring the PyTorch forward (f32 math on the same
    bf16-quantized embedding/conv weights the kernel streams)."""
    x = emb_weight[tokens].astype(jnp.bfloat16).astype(jnp.float32)
    B, C, E = x.shape
    branches = []
    for w, b, K in zip(conv_ws, conv_bs, KERNELS):
        w32 = w.astype(jnp.bfloat16).astype(jnp.float32)
        Lout = E - K + 1
        conv = sum(
            jnp.sum(x[:, :, k:k + Lout] * w32[:, k].reshape(1, C, 1), axis=1)
            for k in range(K)
        ) + b
        r = jnp.maximum(conv, 0.0)
        Pout = Lout - K + 1
        pooled = r[:, :Pout]
        for j in range(1, K):
            pooled = jnp.maximum(pooled, r[:, j:j + Pout])
        branches.append(pooled)
    union = jnp.concatenate(branches, axis=1)
    return union @ fc_w.astype(jnp.float32).T + fc_b.astype(jnp.float32)


if __name__ == "__main__":
    # Small shapes consistent with the module: seq_len = 27 is fixed; the
    # embedding dim E is shrunk 300 -> 32, so the FC input is 4*E - 20 = 108.
    B = 2
    VOCAB = 50
    E = 32
    NUM_LABELS = 4
    F = 4 * E - 20

    key = jax.random.PRNGKey(0)
    k_tok, k_emb, k_cw, k_cb, k_fw, k_fb = jax.random.split(key, 6)

    tokens = jax.random.randint(k_tok, (B, SEQ_LEN), 0, VOCAB, dtype=jnp.int32)
    emb_weight = jax.random.normal(k_emb, (VOCAB, E), dtype=jnp.float32)

    cw_keys = jax.random.split(k_cw, 4)
    cb_keys = jax.random.split(k_cb, 4)
    conv_ws = tuple(
        0.1 * jax.random.normal(cw_keys[i], (SEQ_LEN, K), dtype=jnp.float32)
        for i, K in enumerate(KERNELS)
    )
    conv_bs = tuple(
        0.1 * jax.random.normal(cb_keys[i], (), dtype=jnp.float32)
        for i in range(4)
    )
    fc_w = 0.1 * jax.random.normal(k_fw, (NUM_LABELS, F), dtype=jnp.float32)
    fc_b = 0.1 * jax.random.normal(k_fb, (NUM_LABELS,), dtype=jnp.float32)

    out = cnn_forward(tokens, emb_weight, conv_ws, conv_bs, fc_w, fc_b)
    out = jax.block_until_ready(out)

    ref = cnn_reference(tokens, emb_weight, conv_ws, conv_bs, fc_w, fc_b)
    assert out.shape == (B, NUM_LABELS)
    assert jnp.allclose(out, ref, atol=5e-3, rtol=5e-3), (out, ref)

    print("KERNEL_OK")
</pallas_src>

<mosaic_0001>
module attributes {stable_mosaic.version = 11 : i64} {
  func.func @cnn_kernel(%arg0: i32, %arg1: memref<2x27x32xbf16, #tpu.memory_space<vmem>>, %arg2: memref<14x27xbf16, #tpu.memory_space<vmem>>, %arg3: memref<4x32x128xf32, #tpu.memory_space<vmem>>, %arg4: memref<4xf32, #tpu.memory_space<smem>>, %arg5: memref<1x128xf32, #tpu.memory_space<vmem>>, %arg6: memref<2x128xf32, #tpu.memory_space<vmem>>) attributes {dimension_semantics = [#tpu.dimension_semantics<parallel>], iteration_bounds = array<i64: 1>, scalar_prefetch = 0 : i64, scratch_operands = 0 : i64, tpu.core_type = #tpu.core_type<tc>, window_params = [{transform_indices = @transform_0, window_bounds = array<i64: 2, 27, 32>}, {pipeline_mode = #tpu.pipeline_mode<synchronous>, transform_indices = @transform_1, window_bounds = array<i64: 14, 27>}, {pipeline_mode = #tpu.pipeline_mode<synchronous>, transform_indices = @transform_2, window_bounds = array<i64: 4, 32, 128>}, {transform_indices = @transform_3, window_bounds = array<i64: 4>}, {pipeline_mode = #tpu.pipeline_mode<synchronous>, transform_indices = @transform_4, window_bounds = array<i64: 1, 128>}, {transform_indices = @transform_5, window_bounds = array<i64: 2, 128>}]} {
    %c0 = arith.constant 0 : index
    %c0_0 = arith.constant 0 : index
    %c0_1 = arith.constant 0 : index
    %0 = vector.load %arg1[%c0, %c0_0, %c0_1] : memref<2x27x32xbf16, #tpu.memory_space<vmem>>, vector<2x27x32xbf16>
    %c0_2 = arith.constant 0 : index
    %c0_3 = arith.constant 0 : index
    %1 = vector.load %arg2[%c0_2, %c0_3] : memref<14x27xbf16, #tpu.memory_space<vmem>>, vector<14x27xbf16>
    %2 = vector.shape_cast %1 : vector<14x27xbf16> to vector<1x14x27xbf16>
    %3 = vector.shape_cast %2 : vector<1x14x27xbf16> to vector<1x14x27xbf16>
    %4 = vector.broadcast %3 : vector<1x14x27xbf16> to vector<2x14x27xbf16>
    "tpu.trace_start"() <{level = 10 : i32, message = "btc,bce->bte"}> : () -> ()
    %cst = arith.constant dense<0.000000e+00> : vector<2x14x32xf32>
    %5 = tpu.matmul %4, %0, %cst {dimension_numbers = #tpu.dot_dimension_numbers<[2], [1], [1], [2], [0, 0, 0, 1, 1, 2], [0], [0]>} : vector<2x14x27xbf16>, vector<2x27x32xbf16>, vector<2x14x32xf32> -> vector<2x14x32xf32>
    %cst_4 = arith.constant 0.000000e+00 : f32
    "tpu.trace_stop"() : () -> ()
    %6 = vector.broadcast %cst_4 : f32 to vector<2x128xf32>
    %7 = vector.extract_strided_slice %5 {offsets = [0, 0, 0], sizes = [2, 1, 32], strides = [1, 1, 1]} : vector<2x14x32xf32> to vector<2x1x32xf32>
    %cst_5 = arith.constant dense<0.000000e+00> : vector<2x32xf32>
    %8 = vector.multi_reduction <add>, %7, %cst_5 [1] : vector<2x1x32xf32> to vector<2x32xf32>
    %9 = vector.extract_strided_slice %5 {offsets = [0, 1, 0], sizes = [2, 1, 32], strides = [1, 1, 1]} : vector<2x14x32xf32> to vector<2x1x32xf32>
    %cst_6 = arith.constant dense<0.000000e+00> : vector<2x32xf32>
    %10 = vector.multi_reduction <add>, %9, %cst_6 [1] : vector<2x1x32xf32> to vector<2x32xf32>
    %11 = vector.extract_strided_slice %10 {offsets = [0, 1], sizes = [2, 31], strides = [1, 1]} : vector<2x32xf32> to vector<2x31xf32>
    %12 = vector.extract_strided_slice %10 {offsets = [0, 0], sizes = [2, 1], strides = [1, 1]} : vector<2x32xf32> to vector<2x1xf32>
    %13 = tpu.concatenate %11, %12 in 1 : vector<2x31xf32>, vector<2x1xf32> -> vector<2x32xf32>
    %14 = arith.addf %8, %13 : vector<2x32xf32>
    %c0_7 = arith.constant 0 : index
    %15 = memref.load %arg4[%c0_7] : memref<4xf32, #tpu.memory_space<smem>>
    %16 = vector.broadcast %15 : f32 to vector<2x32xf32>
    %17 = arith.addf %14, %16 : vector<2x32xf32>
    %cst_8 = arith.constant 0.000000e+00 : f32
    %18 = vector.broadcast %cst_8 : f32 to vector<2x32xf32>
    %19 = arith.maximumf %17, %18 : vector<2x32xf32>
    %20 = vector.extract_strided_slice %19 {offsets = [0, 1], sizes = [2, 31], strides = [1, 1]} : vector<2x32xf32> to vector<2x31xf32>
    %21 = vector.extract_strided_slice %19 {offsets = [0, 0], sizes = [2, 1], strides = [1, 1]} : vector<2x32xf32> to vector<2x1xf32>
    %22 = tpu.concatenate %20, %21 in 1 : vector<2x31xf32>, vector<2x1xf32> -> vector<2x32xf32>
    %23 = arith.maximumf %19, %22 : vector<2x32xf32>
    %c0_9 = arith.constant 0 : index
    %c0_10 = arith.constant 0 : index
    %c0_11 = arith.constant 0 : index
    %24 = vector.load %arg3[%c0_9, %c0_10, %c0_11] : memref<4x32x128xf32, #tpu.memory_space<vmem>>, vector<1x32x128xf32>
    %25 = vector.shape_cast %24 : vector<1x32x128xf32> to vector<32x128xf32>
    %cst_12 = arith.constant dense<0.000000e+00> : vector<2x128xf32>
    %26 = tpu.matmul %23, %25, %cst_12 {dimension_numbers = #tpu.dot_dimension_numbers<[1], [0], [0], [1], [0, 0, 1, 1], [], []>} : vector<2x32xf32>, vector<32x128xf32>, vector<2x128xf32> -> vector<2x128xf32>
    %27 = arith.addf %6, %26 : vector<2x128xf32>
    %28 = vector.extract_strided_slice %5 {offsets = [0, 2, 0], sizes = [2, 1, 32], strides = [1, 1, 1]} : vector<2x14x32xf32> to vector<2x1x32xf32>
    %cst_13 = arith.constant dense<0.000000e+00> : vector<2x32xf32>
    %29 = vector.multi_reduction <add>, %28, %cst_13 [1] : vector<2x1x32xf32> to vector<2x32xf32>
    %30 = vector.extract_strided_slice %5 {offsets = [0, 3, 0], sizes = [2, 1, 32], strides = [1, 1, 1]} : vector<2x14x32xf32> to vector<2x1x32xf32>
    %cst_14 = arith.constant dense<0.000000e+00> : vector<2x32xf32>
    %31 = vector.multi_reduction <add>, %30, %cst_14 [1] : vector<2x1x32xf32> to vector<2x32xf32>
    %32 = vector.extract_strided_slice %31 {offsets = [0, 1], sizes = [2, 31], strides = [1, 1]} : vector<2x32xf32> to vector<2x31xf32>
    %33 = vector.extract_strided_slice %31 {offsets = [0, 0], sizes = [2, 1], strides = [1, 1]} : vector<2x32xf32> to vector<2x1xf32>
    %34 = tpu.concatenate %32, %33 in 1 : vector<2x31xf32>, vector<2x1xf32> -> vector<2x32xf32>
    %35 = arith.addf %29, %34 : vector<2x32xf32>
    %36 = vector.extract_strided_slice %5 {offsets = [0, 4, 0], sizes = [2, 1, 32], strides = [1, 1, 1]} : vector<2x14x32xf32> to vector<2x1x32xf32>
    %cst_15 = arith.constant dense<0.000000e+00> : vector<2x32xf32>
    %37 = vector.multi_reduction <add>, %36, %cst_15 [1] : vector<2x1x32xf32> to vector<2x32xf32>
    %38 = vector.extract_strided_slice %37 {offsets = [0, 2], sizes = [2, 30], strides = [1, 1]} : vector<2x32xf32> to vector<2x30xf32>
    %39 = vector.extract_strided_slice %37 {offsets = [0, 0], sizes = [2, 2], strides = [1, 1]} : vector<2x32xf32> to vector<2x2xf32>
    %40 = tpu.concatenate %38, %39 in 1 : vector<2x30xf32>, vector<2x2xf32> -> vector<2x32xf32>
    %41 = arith.addf %35, %40 : vector<2x32xf32>
    %c1 = arith.constant 1 : index
    %42 = memref.load %arg4[%c1] : memref<4xf32, #tpu.memory_space<smem>>
    %43 = vector.broadcast %42 : f32 to vector<2x32xf32>
    %44 = arith.addf %41, %43 : vector<2x32xf32>
    %cst_16 = arith.constant 0.000000e+00 : f32
    %45 = vector.broadcast %cst_16 : f32 to vector<2x32xf32>
    %46 = arith.maximumf %44, %45 : vector<2x32xf32>
    %47 = vector.extract_strided_slice %46 {offsets = [0, 1], sizes = [2, 31], strides = [1, 1]} : vector<2x32xf32> to vector<2x31xf32>
    %48 = vector.extract_strided_slice %46 {offsets = [0, 0], sizes = [2, 1], strides = [1, 1]} : vector<2x32xf32> to vector<2x1xf32>
    %49 = tpu.concatenate %47, %48 in 1 : vector<2x31xf32>, vector<2x1xf32> -> vector<2x32xf32>
    %50 = arith.maximumf %46, %49 : vector<2x32xf32>
    %51 = vector.extract_strided_slice %46 {offsets = [0, 2], sizes = [2, 30], strides = [1, 1]} : vector<2x32xf32> to vector<2x30xf32>
    %52 = vector.extract_strided_slice %46 {offsets = [0, 0], sizes = [2, 2], strides = [1, 1]} : vector<2x32xf32> to vector<2x2xf32>
    %53 = tpu.concatenate %51, %52 in 1 : vector<2x30xf32>, vector<2x2xf32> -> vector<2x32xf32>
    %54 = arith.maximumf %50, %53 : vector<2x32xf32>
    %c1_17 = arith.constant 1 : index
    %c0_18 = arith.constant 0 : index
    %c0_19 = arith.constant 0 : index
    %55 = vector.load %arg3[%c1_17, %c0_18, %c0_19] : memref<4x32x128xf32, #tpu.memory_space<vmem>>, vector<1x32x128xf32>
    %56 = vector.shape_cast %55 : vector<1x32x128xf32> to vector<32x128xf32>
    %cst_20 = arith.constant dense<0.000000e+00> : vector<2x128xf32>
    %57 = tpu.matmul %54, %56, %cst_20 {dimension_numbers = #tpu.dot_dimension_numbers<[1], [0], [0], [1], [0, 0, 1, 1], [], []>} : vector<2x32xf32>, vector<32x128xf32>, vector<2x128xf32> -> vector<2x128xf32>
    %58 = arith.addf %27, %57 : vector<2x128xf32>
    %59 = vector.extract_strided_slice %5 {offsets = [0, 5, 0], sizes = [2, 1, 32], strides = [1, 1, 1]} : vector<2x14x32xf32> to vector<2x1x32xf32>
    %cst_21 = arith.constant dense<0.000000e+00> : vector<2x32xf32>
    %60 = vector.multi_reduction <add>, %59, %cst_21 [1] : vector<2x1x32xf32> to vector<2x32xf32>
    %61 = vector.extract_strided_slice %5 {offsets = [0, 6, 0], sizes = [2, 1, 32], strides = [1, 1, 1]} : vector<2x14x32xf32> to vector<2x1x32xf32>
    %cst_22 = arith.constant dense<0.000000e+00> : vector<2x32xf32>
    %62 = vector.multi_reduction <add>, %61, %cst_22 [1] : vector<2x1x32xf32> to vector<2x32xf32>
    %63 = vector.extract_strided_slice %62 {offsets = [0, 1], sizes = [2, 31], strides = [1, 1]} : vector<2x32xf32> to vector<2x31xf32>
    %64 = vector.extract_strided_slice %62 {offsets = [0, 0], sizes = [2, 1], strides = [1, 1]} : vector<2x32xf32> to vector<2x1xf32>
    %65 = tpu.concatenate %63, %64 in 1 : vector<2x31xf32>, vector<2x1xf32> -> vector<2x32xf32>
    %66 = arith.addf %60, %65 : vector<2x32xf32>
    %67 = vector.extract_strided_slice %5 {offsets = [0, 7, 0], sizes = [2, 1, 32], strides = [1, 1, 1]} : vector<2x14x32xf32> to vector<2x1x32xf32>
    %cst_23 = arith.constant dense<0.000000e+00> : vector<2x32xf32>
    %68 = vector.multi_reduction <add>, %67, %cst_23 [1] : vector<2x1x32xf32> to vector<2x32xf32>
    %69 = vector.extract_strided_slice %68 {offsets = [0, 2], sizes = [2, 30], strides = [1, 1]} : vector<2x32xf32> to vector<2x30xf32>
    %70 = vector.extract_strided_slice %68 {offsets = [0, 0], sizes = [2, 2], strides = [1, 1]} : vector<2x32xf32> to vector<2x2xf32>
    %71 = tpu.concatenate %69, %70 in 1 : vector<2x30xf32>, vector<2x2xf32> -> vector<2x32xf32>
    %72 = arith.addf %66, %71 : vector<2x32xf32>
    %73 = vector.extract_strided_slice %5 {offsets = [0, 8, 0], sizes = [2, 1, 32], strides = [1, 1, 1]} : vector<2x14x32xf32> to vector<2x1x32xf32>
    %cst_24 = arith.constant dense<0.000000e+00> : vector<2x32xf32>
    %74 = vector.multi_reduction <add>, %73, %cst_24 [1] : vector<2x1x32xf32> to vector<2x32xf32>
    %75 = vector.extract_strided_slice %74 {offsets = [0, 3], sizes = [2, 29], strides = [1, 1]} : vector<2x32xf32> to vector<2x29xf32>
    %76 = vector.extract_strided_slice %74 {offsets = [0, 0], sizes = [2, 3], strides = [1, 1]} : vector<2x32xf32> to vector<2x3xf32>
    %77 = tpu.concatenate %75, %76 in 1 : vector<2x29xf32>, vector<2x3xf32> -> vector<2x32xf32>
    %78 = arith.addf %72, %77 : vector<2x32xf32>
    %c2 = arith.constant 2 : index
    %79 = memref.load %arg4[%c2] : memref<4xf32, #tpu.memory_space<smem>>
    %80 = vector.broadcast %79 : f32 to vector<2x32xf32>
    %81 = arith.addf %78, %80 : vector<2x32xf32>
    %cst_25 = arith.constant 0.000000e+00 : f32
    %82 = vector.broadcast %cst_25 : f32 to vector<2x32xf32>
    %83 = arith.maximumf %81, %82 : vector<2x32xf32>
    %84 = vector.extract_strided_slice %83 {offsets = [0, 1], sizes = [2, 31], strides = [1, 1]} : vector<2x32xf32> to vector<2x31xf32>
    %85 = vector.extract_strided_slice %83 {offsets = [0, 0], sizes = [2, 1], strides = [1, 1]} : vector<2x32xf32> to vector<2x1xf32>
    %86 = tpu.concatenate %84, %85 in 1 : vector<2x31xf32>, vector<2x1xf32> -> vector<2x32xf32>
    %87 = arith.maximumf %83, %86 : vector<2x32xf32>
    %88 = vector.extract_strided_slice %83 {offsets = [0, 2], sizes = [2, 30], strides = [1, 1]} : vector<2x32xf32> to vector<2x30xf32>
    %89 = vector.extract_strided_slice %83 {offsets = [0, 0], sizes = [2, 2], strides = [1, 1]} : vector<2x32xf32> to vector<2x2xf32>
    %90 = tpu.concatenate %88, %89 in 1 : vector<2x30xf32>, vector<2x2xf32> -> vector<2x32xf32>
    %91 = arith.maximumf %87, %90 : vector<2x32xf32>
    %92 = vector.extract_strided_slice %83 {offsets = [0, 3], sizes = [2, 29], strides = [1, 1]} : vector<2x32xf32> to vector<2x29xf32>
    %93 = vector.extract_strided_slice %83 {offsets = [0, 0], sizes = [2, 3], strides = [1, 1]} : vector<2x32xf32> to vector<2x3xf32>
    %94 = tpu.concatenate %92, %93 in 1 : vector<2x29xf32>, vector<2x3xf32> -> vector<2x32xf32>
    %95 = arith.maximumf %91, %94 : vector<2x32xf32>
    %c2_26 = arith.constant 2 : index
    %c0_27 = arith.constant 0 : index
    %c0_28 = arith.constant 0 : index
    %96 = vector.load %arg3[%c2_26, %c0_27, %c0_28] : memref<4x32x128xf32, #tpu.memory_space<vmem>>, vector<1x32x128xf32>
    %97 = vector.shape_cast %96 : vector<1x32x128xf32> to vector<32x128xf32>
    %cst_29 = arith.constant dense<0.000000e+00> : vector<2x128xf32>
    %98 = tpu.matmul %95, %97, %cst_29 {dimension_numbers = #tpu.dot_dimension_numbers<[1], [0], [0], [1], [0, 0, 1, 1], [], []>} : vector<2x32xf32>, vector<32x128xf32>, vector<2x128xf32> -> vector<2x128xf32>
    %99 = arith.addf %58, %98 : vector<2x128xf32>
    %100 = vector.extract_strided_slice %5 {offsets = [0, 9, 0], sizes = [2, 1, 32], strides = [1, 1, 1]} : vector<2x14x32xf32> to vector<2x1x32xf32>
    %cst_30 = arith.constant dense<0.000000e+00> : vector<2x32xf32>
    %101 = vector.multi_reduction <add>, %100, %cst_30 [1] : vector<2x1x32xf32> to vector<2x32xf32>
    %102 = vector.extract_strided_slice %5 {offsets = [0, 10, 0], sizes = [2, 1, 32], strides = [1, 1, 1]} : vector<2x14x32xf32> to vector<2x1x32xf32>
    %cst_31 = arith.constant dense<0.000000e+00> : vector<2x32xf32>
    %103 = vector.multi_reduction <add>, %102, %cst_31 [1] : vector<2x1x32xf32> to vector<2x32xf32>
    %104 = vector.extract_strided_slice %103 {offsets = [0, 1], sizes = [2, 31], strides = [1, 1]} : vector<2x32xf32> to vector<2x31xf32>
    %105 = vector.extract_strided_slice %103 {offsets = [0, 0], sizes = [2, 1], strides = [1, 1]} : vector<2x32xf32> to vector<2x1xf32>
    %106 = tpu.concatenate %104, %105 in 1 : vector<2x31xf32>, vector<2x1xf32> -> vector<2x32xf32>
    %107 = arith.addf %101, %106 : vector<2x32xf32>
    %108 = vector.extract_strided_slice %5 {offsets = [0, 11, 0], sizes = [2, 1, 32], strides = [1, 1, 1]} : vector<2x14x32xf32> to vector<2x1x32xf32>
    %cst_32 = arith.constant dense<0.000000e+00> : vector<2x32xf32>
    %109 = vector.multi_reduction <add>, %108, %cst_32 [1] : vector<2x1x32xf32> to vector<2x32xf32>
    %110 = vector.extract_strided_slice %109 {offsets = [0, 2], sizes = [2, 30], strides = [1, 1]} : vector<2x32xf32> to vector<2x30xf32>
    %111 = vector.extract_strided_slice %109 {offsets = [0, 0], sizes = [2, 2], strides = [1, 1]} : vector<2x32xf32> to vector<2x2xf32>
    %112 = tpu.concatenate %110, %111 in 1 : vector<2x30xf32>, vector<2x2xf32> -> vector<2x32xf32>
    %113 = arith.addf %107, %112 : vector<2x32xf32>
    %114 = vector.extract_strided_slice %5 {offsets = [0, 12, 0], sizes = [2, 1, 32], strides = [1, 1, 1]} : vector<2x14x32xf32> to vector<2x1x32xf32>
    %cst_33 = arith.constant dense<0.000000e+00> : vector<2x32xf32>
    %115 = vector.multi_reduction <add>, %114, %cst_33 [1] : vector<2x1x32xf32> to vector<2x32xf32>
    %116 = vector.extract_strided_slice %115 {offsets = [0, 3], sizes = [2, 29], strides = [1, 1]} : vector<2x32xf32> to vector<2x29xf32>
    %117 = vector.extract_strided_slice %115 {offsets = [0, 0], sizes = [2, 3], strides = [1, 1]} : vector<2x32xf32> to vector<2x3xf32>
    %118 = tpu.concatenate %116, %117 in 1 : vector<2x29xf32>, vector<2x3xf32> -> vector<2x32xf32>
    %119 = arith.addf %113, %118 : vector<2x32xf32>
    %120 = vector.extract_strided_slice %5 {offsets = [0, 13, 0], sizes = [2, 1, 32], strides = [1, 1, 1]} : vector<2x14x32xf32> to vector<2x1x32xf32>
    %cst_34 = arith.constant dense<0.000000e+00> : vector<2x32xf32>
    %121 = vector.multi_reduction <add>, %120, %cst_34 [1] : vector<2x1x32xf32> to vector<2x32xf32>
    %122 = vector.extract_strided_slice %121 {offsets = [0, 4], sizes = [2, 28], strides = [1, 1]} : vector<2x32xf32> to vector<2x28xf32>
    %123 = vector.extract_strided_slice %121 {offsets = [0, 0], sizes = [2, 4], strides = [1, 1]} : vector<2x32xf32> to vector<2x4xf32>
    %124 = tpu.concatenate %122, %123 in 1 : vector<2x28xf32>, vector<2x4xf32> -> vector<2x32xf32>
    %125 = arith.addf %119, %124 : vector<2x32xf32>
    %c3 = arith.constant 3 : index
    %126 = memref.load %arg4[%c3] : memref<4xf32, #tpu.memory_space<smem>>
    %127 = vector.broadcast %126 : f32 to vector<2x32xf32>
    %128 = arith.addf %125, %127 : vector<2x32xf32>
    %cst_35 = arith.constant 0.000000e+00 : f32
    %129 = vector.broadcast %cst_35 : f32 to vector<2x32xf32>
    %130 = arith.maximumf %128, %129 : vector<2x32xf32>
    %131 = vector.extract_strided_slice %130 {offsets = [0, 1], sizes = [2, 31], strides = [1, 1]} : vector<2x32xf32> to vector<2x31xf32>
    %132 = vector.extract_strided_slice %130 {offsets = [0, 0], sizes = [2, 1], strides = [1, 1]} : vector<2x32xf32> to vector<2x1xf32>
    %133 = tpu.concatenate %131, %132 in 1 : vector<2x31xf32>, vector<2x1xf32> -> vector<2x32xf32>
    %134 = arith.maximumf %130, %133 : vector<2x32xf32>
    %135 = vector.extract_strided_slice %130 {offsets = [0, 2], sizes = [2, 30], strides = [1, 1]} : vector<2x32xf32> to vector<2x30xf32>
    %136 = vector.extract_strided_slice %130 {offsets = [0, 0], sizes = [2, 2], strides = [1, 1]} : vector<2x32xf32> to vector<2x2xf32>
    %137 = tpu.concatenate %135, %136 in 1 : vector<2x30xf32>, vector<2x2xf32> -> vector<2x32xf32>
    %138 = arith.maximumf %134, %137 : vector<2x32xf32>
    %139 = vector.extract_strided_slice %130 {offsets = [0, 3], sizes = [2, 29], strides = [1, 1]} : vector<2x32xf32> to vector<2x29xf32>
    %140 = vector.extract_strided_slice %130 {offsets = [0, 0], sizes = [2, 3], strides = [1, 1]} : vector<2x32xf32> to vector<2x3xf32>
    %141 = tpu.concatenate %139, %140 in 1 : vector<2x29xf32>, vector<2x3xf32> -> vector<2x32xf32>
    %142 = arith.maximumf %138, %141 : vector<2x32xf32>
    %143 = vector.extract_strided_slice %130 {offsets = [0, 4], sizes = [2, 28], strides = [1, 1]} : vector<2x32xf32> to vector<2x28xf32>
    %144 = vector.extract_strided_slice %130 {offsets = [0, 0], sizes = [2, 4], strides = [1, 1]} : vector<2x32xf32> to vector<2x4xf32>
    %145 = tpu.concatenate %143, %144 in 1 : vector<2x28xf32>, vector<2x4xf32> -> vector<2x32xf32>
    %146 = arith.maximumf %142, %145 : vector<2x32xf32>
    %c3_36 = arith.constant 3 : index
    %c0_37 = arith.constant 0 : index
    %c0_38 = arith.constant 0 : index
    %147 = vector.load %arg3[%c3_36, %c0_37, %c0_38] : memref<4x32x128xf32, #tpu.memory_space<vmem>>, vector<1x32x128xf32>
    %148 = vector.shape_cast %147 : vector<1x32x128xf32> to vector<32x128xf32>
    %cst_39 = arith.constant dense<0.000000e+00> : vector<2x128xf32>
    %149 = tpu.matmul %146, %148, %cst_39 {dimension_numbers = #tpu.dot_dimension_numbers<[1], [0], [0], [1], [0, 0, 1, 1], [], []>} : vector<2x32xf32>, vector<32x128xf32>, vector<2x128xf32> -> vector<2x128xf32>
    %150 = arith.addf %99, %149 : vector<2x128xf32>
    %c0_40 = arith.constant 0 : index
    %c0_41 = arith.constant 0 : index
    %151 = vector.load %arg5[%c0_40, %c0_41] : memref<1x128xf32, #tpu.memory_space<vmem>>, vector<1x128xf32>
    %152 = vector.broadcast %151 : vector<1x128xf32> to vector<2x128xf32>
    %153 = arith.addf %150, %152 : vector<2x128xf32>
    %c0_42 = arith.constant 0 : index
    %c0_43 = arith.constant 0 : index
    %154 = vector.load %arg6[%c0_42, %c0_43] : memref<2x128xf32, #tpu.memory_space<vmem>>, vector<2x128xf32>
    tpu.vector_store %arg6[%c0_42, %c0_43], %153 {strides = array<i32>} : memref<2x128xf32, #tpu.memory_space<vmem>>, vector<2x128xf32>,
    return
  }
  func.func @transform_0(%arg0: i32) -> (i32, i32, i32) {
    %c0_i32 = arith.constant 0 : i32
    %c0_i32_0 = arith.constant 0 : i32
    %c0_i32_1 = arith.constant 0 : i32
    return %arg0, %c0_i32, %c0_i32_0 : i32, i32, i32
  }
  func.func @transform_1(%arg0: i32) -> (i32, i32) {
    %c0_i32 = arith.constant 0 : i32
    %c0_i32_0 = arith.constant 0 : i32
    %c0_i32_1 = arith.constant 0 : i32
    return %c0_i32, %c0_i32_0 : i32, i32
  }
  func.func @transform_2(%arg0: i32) -> (i32, i32, i32) {
    %c0_i32 = arith.constant 0 : i32
    %c0_i32_0 = arith.constant 0 : i32
    %c0_i32_1 = arith.constant 0 : i32
    %c0_i32_2 = arith.constant 0 : i32
    return %c0_i32, %c0_i32_0, %c0_i32_1 : i32, i32, i32
  }
  func.func @transform_3(%arg0: i32) -> i32 {
    %c0_i32 = arith.constant 0 : i32
    %c0_i32_0 = arith.constant 0 : i32
    return %c0_i32 : i32
  }
  func.func @transform_4(%arg0: i32) -> (i32, i32) {
    %c0_i32 = arith.constant 0 : i32
    %c0_i32_0 = arith.constant 0 : i32
    %c0_i32_1 = arith.constant 0 : i32
    return %c0_i32, %c0_i32_0 : i32, i32
  }
  func.func @transform_5(%arg0: i32) -> (i32, i32) {
    %c0_i32 = arith.constant 0 : i32
    %c0_i32_0 = arith.constant 0 : i32
    return %arg0, %c0_i32 : i32, i32
  }
}

</mosaic_0001>

<bundles_post_ra>
// kernel: tpu_custom_call.1
= control target key start
LH: loop header
LB: loop body
LE: loop exit
PB: predicated region body
PF: predicated region fallthrough
CT: control target
= control target key end

     0   :  { %10 = vsyncpa [#allocation3], 0  ;;  %s1389_s0 = inlined_call_operand.vmem [shape: bf16[2,27,32], index: 0, kind: input, shape index: {}]   ;;  %s1390_s1 = inlined_call_operand.vmem [shape: bf16[14,27], index: 1, kind: input, shape index: {}]   ;;  %s1391_s2 = inlined_call_operand.hbm [shape: f32[4,32,128], index: 2, kind: input, shape index: {}]   ;;  %s1392_s3 = inlined_call_operand.vmem [shape: f32[4], index: 3, kind: input, shape index: {}]   ;;  %s1393_s4 = inlined_call_operand.vmem [shape: f32[1,128], index: 4, kind: input, shape index: {}]   ;;  %s1394_s5 = inlined_call_operand.hbm [shape: f32[2,128], index: 5, kind: output, shape index: {}]  }
   0x1   :  { %11 = vsyncpa [#allocation5], 0 }
   0x2   :  { %12 = vsyncpa [#allocation4], 0  ;;  %s1092_s18 = smov [#allocation2]   ;;  %s35_s22 = sshll.u32 %s1392_s3, 4  ;;  %s36_s22 = int_to_ptr.vmem [resolvable:$true] %s35_s22 }
   0x3   :  { %s22_s19 = sshll.u32 %s1092_s18, 4  ;;  %s1030_s25 = scalar_lea.hbm %s1391_s2, 2048  ;;  %s23_s19 = int_to_ptr.vmem [resolvable:$true] %s22_s19 }
   0x4   :  { %p1031_p0 = scmp.ne.s32.totalorder %s1391_s2, %s1030_s25  ;;  %p1034_p1 = scmp.lt.u32.totalorder %s1030_s25, %s1391_s2 }
   0x6   :  { %p1036_p2 = pnand %p1034_p1, %p1031_p0 }
   0x8   :  { %1039 = shalt.err (!%p1036_p2)
}
   0x9   :  { %s1040_s30 = scalar_lea.vmem %s23_s19, 2048  ;;  %p1045_p4 = scmp.lt.s32.totalorder %s23_s19, %s23_s19 }
   0xa   :  { %p1041_p3 = scmp.ne.s32.totalorder %s23_s19, %s1040_s30  ;;  %p1046_p5 = scmp.lt.s32.totalorder %s1040_s30, %s1040_s30 }
   0xc   :  { %p1047_p6 = por %p1046_p5, %p1045_p4 }
   0xe   :  { %p1048_p7 = pnand %p1047_p6, %p1041_p3 }
  0x10   :  { %1051 = shalt.err (!%p1048_p7)
}
  0x11   :  { %s1093_s3 = smov 128   ;;  %s1094_s6 = smov 8  }
  0x12   :  { %28 = dma.hbm_to_vmem [thread:$0]  %s1391_s2, 2048, %s23_s19, [#allocation3], %s1093_s3, %s1093_s3, %s1094_s6  }
  0x13   :  { %s1052_s9 = scalar_lea.vmem %s36_s22, 16  ;;  %p1057_p9 = scmp.lt.s32.totalorder %s36_s22, %s36_s22 }
  0x14   :  { %p1053_p8 = scmp.ne.s32.totalorder %s36_s22, %s1052_s9  ;;  %p1058_p10 = scmp.lt.s32.totalorder %s1052_s9, %s1052_s9 }
  0x16   :  { %p1059_p11 = por %p1058_p10, %p1057_p9 }
  0x18   :  { %p1060_p12 = pnand %p1059_p11, %p1053_p8 }
  0x1a   :  { %1063 = shalt.err (!%p1060_p12)
}
  0x1b   :  { %s1095_s10 = smov [#allocation6]  }
  0x1c   :  { %38 = dma.vmem_to_smem %s36_s22, 16, %s1095_s10, [#allocation5]  }
  0x1d   :  { %1086 = dma.done.wait [#allocation3], 2048  }
  0x1e   :  { %1087 = vsyncadd [#allocation3], 4294965248 }
  0x1f   :  { %1088 = dma.done.wait [#allocation5], 16  }
  0x20   :  { %1089 = vsyncadd [#allocation5], 4294967280 }
  0x21   :  { %47 = sfence }
  0x22   :  { %v1025_v0 = vld [vmem:[%s1389_s0] sm:$0xff]   ;;  %v1096_v1 = vmov 0.0   ;;  %v1026_v2 = vld [vmem:[%s1389_s0 + $0x10] sm:$0xff]   ;;  %vm79_vm0 = vcmask 1044480   ;;  %v1027_v3 = vld [vmem:[%s1389_s0 + $0x8] sm:$0x3f]  }
  0x23   :  { %924 = vmatprep.subr.bf16.mxu0 %v1096_v1  ;;  %932 = vmatprep.subr.bf16.mxu1 %v1096_v1  ;;  %vm80_vm1 = vcmask 1045504   ;;  %v1097_v4 = vmov 65535   ;;  %v1028_v6 = vld [vmem:[%s1389_s0 + $0x18] sm:$0x3f]   ;;  %vm1098_vm2 = vmmov 0   ;;  %vm75_vm3 = vcmask 220160  }
  0x24   :  { %925 = vmatpush3.bf16.msra.mxu0 %v1025_v0  ;;  %933 = vmatpush3.bf16.msra.mxu1 %v1026_v2  ;;  %v81_v5 = vsel %vm79_vm0, 4294967295, %v1097_v4  ;;  %v1029_v10 = vld [vmem:[%s1390_s1] sm:$0x7f]   ;;  %vm248_vm4 = vcmask 1045509   ;;  %vm232_vm5 = vcmask 1044484   ;;  %vm461_vm6 = vcmask 1047559  }
  0x25   :  { %926 = vmatprep.subr.bf16.mxu0 %v1096_v1  ;;  %934 = vmatprep.subr.bf16.mxu1 %v1096_v1  ;;  %v82_v7 = vsel %vm80_vm1, %v81_v5, 0  ;;  %s1099_s0 = smov 30   ;;  %s1100_s1 = smov 126   ;;  %vm187_vm7 = vcmask 1042434   ;;  %vm274_vm8 = vcmask 1043459   ;;  %vm213_vm9 = vcmask 1041409  }
  0x26   :  { %928 = vmatprep.mubr.msk.bf16.mxu0 %vm1098_vm2, %v1096_v1  ;;  %936 = vmatprep.mubr.msk.bf16.mxu1 %vm1098_vm2, %v1096_v1  ;;  %v84_v8 = vand.u32 %v1027_v3, %v82_v7  ;;  %v139_v9 = vand.u32 %v1028_v6, %v82_v7  ;;  %vm529_vm10 = vcmask 1046534   ;;  %s1101_s20 = smov 127   ;;  %s1102_s21 = smov 31   ;;  %vm195_vm11 = vcmask 252928   ;;  %v228_v46 = vld [vmem:[#allocation2] sm:$0xff]  ;;  %v229_v47 = vld [vmem:[#allocation2 + $0x8] sm:$0xff] }
  0x27   :  { %s1103_s22 = smov 29   ;;  %s1104_s23 = smov 125   ;;  %vm256_vm12 = vcmask 244736   ;;  %v991_v54 = vpack.c.bf16 %v229_v47, %v228_v46  ;;  %v1107_v58 = vmov 0.0|0.0   ;;  %v230_v62 = vld [vmem:[#allocation2 + $0x10] sm:$0xff]  ;;  %v231_v63 = vld [vmem:[#allocation2 + $0x18] sm:$0xff] }
  0x28   :  { %927 = vmatpush3.bf16.msra.mxu0 %v84_v8  ;;  %935 = vmatpush3.bf16.msra.mxu1 %v139_v9  ;;  %s1105_s24 = smov 28   ;;  %s1106_s25 = smov 124   ;;  %v994_v6 = vpack.c.bf16 %v231_v63, %v230_v62  ;;  %vm511_vm13 = vcmask 236544   ;;  %vm705_vm14 = vcmask 228352   ;;  %vm312_vm15 = vcmask 261120  }
  0x29   :  { %s1233_s26 = sld [smem:[#allocation6 + $0x1]]  ;;  %s1237_s27 = sld [smem:[#allocation6]]  ;;  %990 = vmatprep.subr.bf16.mxu1 %v1107_v58  ;;  %984 = vmatprep.subr.bf16.mxu0 %v1107_v58 }
  0x2a   :  { %s1257_s28 = sld [smem:[#allocation6 + $0x2]]  ;;  %s1283_s29 = sld [smem:[#allocation6 + $0x3]] }
  0x2b   :  { %929 = vmatmul.mubr.msk.bf16.vlgmr.msra.gmra.mrb[0].mxu0 %vm75_vm3, %v1029_v10  ;;  %937 = vmatmul.mubr.msk.bf16.vlgmr.msra.gmra.mrb[0].mxu1 %vm75_vm3, %v1029_v10  ;;  %s1108_s6 = smov [#allocation7]  }
  0x2c   :  { %959 = vmatprep.mubr.msk.f32.mxu1 %vm1098_vm2, %v1096_v1  ;;  %948 = vmatprep.mubr.msk.f32.mxu0 %vm1098_vm2, %v1096_v1  ;;  %s873_s7 = sshll.u32 %s1108_s6, 4  ;;  %s874_s7 = int_to_ptr.vmem [resolvable:$true] %s873_s7 }
  0x2d   :  { %992 = vmatpush3.bf16.msra.mxu1 %v991_v54  ;;  %s1064_s8 = scalar_lea.vmem %s874_s7, 32  ;;  %p1069_p0 = scmp.lt.s32.totalorder %s874_s7, %s874_s7 }
  0x2e   :  { %993 = vmatprep.subr.bf16.mxu1 %v1107_v58  ;;  %p1065_p13 = scmp.ne.s32.totalorder %s874_s7, %s1064_s8  ;;  %p1070_p1 = scmp.lt.s32.totalorder %s1064_s8, %s1064_s8 }
  0x2f   :  { %v266_v52 = vstv %s1233_s26  ;;  %v205_v61 = vstv %s1237_s27 }
  0x30   :  { %v521_v46 = vstv %s1257_s28  ;;  %p1071_p2 = por %p1070_p1, %p1069_p0 }
  0x31   :  { %995 = vmatpush3.bf16.msra.mxu1 %v994_v6 }
  0x32   :  { %1002 = vmatprep.subr.bf16.mxu1 %v1107_v58  ;;  %p1072_p3 = pnand %p1071_p2, %p1065_p13 }
  0xfe   :  { %v1181_v11 = vpop.f32.mrb[0].mxu0  ;;  %v1183_v12 = vpop.f32.mrb[0].mxu1 }
  0xff   :  { %v186_v13 = vrot.slane %v1183_v12, 7  ;;  %v938_v14 = vpop.f32.mrb[1].mxu1  ;;  %483 = vrot.lane.b32.xlu1 %v1181_v11, %s1099_s0  ;;  %477 = vrot.lane.b32.xlu0 %v1181_v11, %s1100_s1  ;;  %v930_v15 = vpop.f32.mrb[1].mxu0 }
 0x100   :  { %v1190_v16 = vpop.f32.mrb[2].mxu0  ;;  %v1192_v17 = vpop.f32.mrb[2].mxu1  ;;  %v303_v14 = vld [vmem:[#allocation2 + $0x20] sm:$0xff]  ;;  %v304_v15 = vld [vmem:[#allocation2 + $0x28] sm:$0xff] }
 0x101   :  { %v503_v18 = vrot.slane %v1192_v17, 7  ;;  %v931_v19 = vpop.f32.mrb[3].mxu0  ;;  %v939_v20 = vpop.f32.mrb[3].mxu1  ;;  %v249_v21 = vsel %vm248_vm4, %v186_v13, %v1181_v11  ;;  %v233_v22 = vsel %vm232_vm5, %v186_v13, %v1181_v11  ;;  %v462_v23 = vsel %vm461_vm6, %v186_v13, %v1181_v11 }
 0x102   :  { %v188_v24 = vsel %vm187_vm7, %v186_v13, %v1181_v11 }
 0x103   :  { %485 = vrot.lane.b32.xlu1 %v186_v13, %s1099_s0  ;;  %479 = vrot.lane.b32.xlu0 %v186_v13, %s1100_s1  ;;  %v653_v25 = vsel %vm274_vm8, %v503_v18, %v1190_v16  ;;  %v668_v26 = vsel %vm232_vm5, %v503_v18, %v1190_v16  ;;  %v504_v27 = vsel %vm213_vm9, %v503_v18, %v1190_v16 }
 0x104   :  { %v683_v28 = vsel %vm248_vm4, %v503_v18, %v1190_v16  ;;  %v698_v29 = vsel %vm529_vm10, %v503_v18, %v1190_v16 }
 0x107   :  { %250 = vrot.lane.b32.xlu1 %v249_v21, %s1100_s1  ;;  %234 = vrot.lane.b32.xlu0 %v233_v22, %s1101_s20 }
 0x10b   :  { %253 = vrot.lane.b32.xlu1 %v249_v21, %s1099_s0  ;;  %237 = vrot.lane.b32.xlu0 %v233_v22, %s1102_s21 }
 0x10f   :  { %466 = vrot.lane.b32.xlu1 %v462_v23, %s1102_s21  ;;  %463 = vrot.lane.b32.xlu0 %v462_v23, %s1101_s20 }
 0x113   :  { %192 = vrot.lane.b32.xlu1 %v188_v24, %s1102_s21  ;;  %189 = vrot.lane.b32.xlu0 %v188_v24, %s1101_s20 }
 0x117   :  { %657 = vrot.lane.b32.xlu1 %v653_v25, %s1102_s21  ;;  %654 = vrot.lane.b32.xlu0 %v653_v25, %s1101_s20  ;;  %v985_v25 = vpack.c.bf16 %v304_v15, %v303_v14 }
 0x119   :  { %986 = vmatpush3.bf16.msra.mxu0 %v985_v25 }
 0x11a   :  { %987 = vmatprep.subr.bf16.mxu0 %v1107_v58 }
 0x11b   :  { %672 = vrot.lane.b32.xlu1 %v668_v26, %s1099_s0  ;;  %669 = vrot.lane.b32.xlu0 %v668_v26, %s1100_s1 }
 0x11f   :  { %508 = vrot.lane.b32.xlu1 %v504_v27, %s1103_s22  ;;  %505 = vrot.lane.b32.xlu0 %v504_v27, %s1104_s23 }
 0x123   :  { %687 = vrot.lane.b32.xlu1 %v683_v28, %s1103_s22  ;;  %684 = vrot.lane.b32.xlu0 %v683_v28, %s1104_s23 }
 0x127   :  { %702 = vrot.lane.b32.xlu1 %v698_v29, %s1105_s24  ;;  %699 = vrot.lane.b32.xlu0 %v698_v29, %s1106_s25 }
 0x171   :  { %v484_v30 = vpop.permute.xlu1 %483  ;;  %v478_v31 = vpop.permute.xlu0 %477 }
 0x172   :  { %v489_v13 = vsel %vm256_vm12, %v478_v31, %v484_v30  ;;  %v305_v31 = vld [vmem:[#allocation2 + $0x30] sm:$0xff] }
 0x173   :  { %v493_v26 = vrot.slane %v489_v13, 2  ;;  %v715_v13 = vstv %s1283_s29 }
 0x175   :  { %v486_v32 = vpop.permute.xlu1 %485  ;;  %v480_v33 = vpop.permute.xlu0 %479 }
 0x176   :  { %v490_v18 = vsel %vm256_vm12, %v480_v33, %v486_v32  ;;  %v306_v32 = vld [vmem:[#allocation2 + $0x38] sm:$0xff] }
 0x177   :  { %v494_v30 = vrot.slane %v490_v18, 3 }
 0x179   :  { %v251_v34 = vpop.permute.xlu1 %250  ;;  %v235_v35 = vpop.permute.xlu0 %234 }
 0x17d   :  { %v254_v36 = vpop.permute.xlu1 %253  ;;  %v238_v37 = vpop.permute.xlu0 %237 }
 0x17e   :  { %v240_v38 = vsel %vm195_vm11, %v235_v35, %v238_v37  ;;  %v257_v40 = vsel %vm256_vm12, %v251_v34, %v254_v36  ;;  %v988_v37 = vpack.c.bf16 %v306_v32, %v305_v31 }
 0x17f   :  { %v243_v39 = vrot.slane %v240_v38, 2  ;;  %v260_v44 = vrot.slane %v257_v40, 3  ;;  %v242_v45 = vrot.slane %v240_v38, 1  ;;  %v259_v59 = vrot.slane %v257_v40, 2 }
 0x180   :  { %989 = vmatpush3.bf16.msra.mxu0 %v988_v37 }
 0x181   :  { %v247_v41 = vadd.f32 %v243_v39, %v1183_v12  ;;  %v467_v42 = vpop.permute.xlu1 %466  ;;  %v464_v43 = vpop.permute.xlu0 %463  ;;  %v246_v55 = vadd.f32 %v242_v45, %v1181_v11  ;;  %996 = vmatprep.subr.bf16.mxu0 %v1107_v58 }
 0x182   :  { %v469_v49 = vsel %vm195_vm11, %v464_v43, %v467_v42 }
 0x183   :  { %v264_v48 = vadd.f32 %v260_v44, %v247_v41  ;;  %v471_v60 = vrot.slane %v469_v49, 1  ;;  %v472_v7 = vrot.slane %v469_v49, 2  ;;  %v263_v8 = vadd.f32 %v259_v59, %v246_v55 }
 0x185   :  { %v193_v50 = vpop.permute.xlu1 %192  ;;  %v190_v51 = vpop.permute.xlu0 %189  ;;  %v1247_v0 = vadd.f32 %v266_v52, %v264_v48  ;;  %v475_v20 = vadd.f32 %v471_v60, %v1181_v11  ;;  %v476_v24 = vadd.f32 %v472_v7, %v1183_v12  ;;  %v1268_v29 = vadd.f32 %v266_v52, %v263_v8 }
 0x186   :  { %v196_v53 = vsel %vm195_vm11, %v190_v51, %v193_v50 }
 0x187   :  { %v198_v56 = vrot.slane %v196_v53, 1  ;;  %v199_v57 = vrot.slane %v196_v53, 2  ;;  %v270_v19 = vmax.f32 %v1247_v0, 0.0  ;;  %v497_v34 = vadd.f32 %v493_v26, %v475_v20 }
 0x188   :  { %v498_v39 = vadd.f32 %v494_v30, %v476_v24  ;;  %v269_v44 = vmax.f32 %v1268_v29, 0.0  ;;  %v571_v29 = vld [vmem:[#allocation2 + $0x40] sm:$0xff] }
 0x189   :  { %v202_v2 = vadd.f32 %v198_v56, %v1181_v11  ;;  %v203_v3 = vadd.f32 %v199_v57, %v1183_v12  ;;  %v658_v4 = vpop.permute.xlu1 %657  ;;  %v655_v5 = vpop.permute.xlu0 %654  ;;  %v273_v36 = vrot.slane %v270_v19, 7 }
 0x18a   :  { %v660_v11 = vsel %vm195_vm11, %v655_v5, %v658_v4 }
 0x18b   :  { %v1252_v9 = vadd.f32 %v205_v61, %v203_v3  ;;  %v1254_v10 = vadd.f32 %v205_v61, %v202_v2  ;;  %v663_v41 = vrot.slane %v660_v11, 2  ;;  %v662_v45 = vrot.slane %v660_v11, 1 }
 0x18c   :  { %v275_v52 = vsel %vm274_vm8, %v273_v36, %v269_v44 }
 0x18d   :  { %v209_v21 = vmax.f32 %v1252_v9, 0.0  ;;  %v673_v22 = vpop.permute.xlu1 %672  ;;  %v670_v23 = vpop.permute.xlu0 %669  ;;  %v208_v27 = vmax.f32 %v1254_v10, 0.0  ;;  %v667_v55 = vadd.f32 %v663_v41, %v1192_v17  ;;  %v666_v60 = vadd.f32 %v662_v45, %v1190_v16 }
 0x18e   :  { %v675_v38 = vsel %vm256_vm12, %v670_v23, %v673_v22 }
 0x18f   :  { %v212_v28 = vrot.slane %v209_v21, 7  ;;  %v678_v47 = vrot.slane %v675_v38, 3  ;;  %v677_v53 = vrot.slane %v675_v38, 2 }
 0x191   :  { %v509_v33 = vpop.permute.xlu1 %508  ;;  %v506_v12 = vpop.permute.xlu0 %505  ;;  %v214_v35 = vsel %vm213_vm9, %v212_v28, %v208_v27  ;;  %v682_v61 = vadd.f32 %v678_v47, %v667_v55  ;;  %v681_v4 = vadd.f32 %v677_v53, %v666_v60 }
 0x192   :  { %v512_v40 = vsel %vm511_vm13, %v506_v12, %v509_v33  ;;  %218 = vrot.lane.b32.xlu1 %v214_v35, %s1102_s21  ;;  %215 = vrot.lane.b32.xlu0 %v214_v35, %s1101_s20  ;;  %v777_v33 = vld [vmem:[#allocation2 + $0x60] sm:$0xff] }
 0x193   :  { %v514_v42 = vrot.slane %v512_v40, 3  ;;  %v515_v43 = vrot.slane %v512_v40, 4 }
 0x195   :  { %v518_v48 = vadd.f32 %v514_v42, %v497_v34  ;;  %v519_v49 = vadd.f32 %v515_v43, %v498_v39  ;;  %v688_v50 = vpop.permute.xlu1 %687  ;;  %v685_v51 = vpop.permute.xlu0 %684  ;;  %v778_v34 = vld [vmem:[#allocation2 + $0x68] sm:$0xff]  ;;  %v779_v42 = vld [vmem:[#allocation2 + $0x70] sm:$0xff]  ;;  %v780_v43 = vld [vmem:[#allocation2 + $0x78] sm:$0xff] }
 0x196   :  { %v690_v54 = vsel %vm511_vm13, %v685_v51, %v688_v50  ;;  %279 = vrot.lane.b32.xlu1 %v275_v52, %s1102_s21  ;;  %276 = vrot.lane.b32.xlu0 %v275_v52, %s1101_s20  ;;  %v1003_v41 = vpack.c.bf16 %v778_v34, %v777_v33 }
 0x197   :  { %v1293_v56 = vadd.f32 %v521_v46, %v518_v48  ;;  %v1295_v57 = vadd.f32 %v521_v46, %v519_v49  ;;  %v693_v59 = vrot.slane %v690_v54, 4  ;;  %v692_v63 = vrot.slane %v690_v54, 3 }
 0x198   :  { %v1006_v49 = vpack.c.bf16 %v780_v43, %v779_v42 }
 0x199   :  { %v525_v62 = vmax.f32 %v1295_v57, 0.0  ;;  %v703_v2 = vpop.permute.xlu1 %702  ;;  %v700_v3 = vpop.permute.xlu0 %699  ;;  %v524_v5 = vmax.f32 %v1293_v56, 0.0  ;;  %v697_v7 = vadd.f32 %v693_v59, %v682_v61  ;;  %v696_v14 = vadd.f32 %v692_v63, %v681_v4  ;;  %v574_v59 = vld [vmem:[#allocation2 + $0x58] sm:$0xff] }
 0x19a   :  { %v706_v6 = vsel %vm705_vm14, %v700_v3, %v703_v2  ;;  %292 = vrot.lane.b32.xlu1 %v275_v52, %s1099_s0  ;;  %289 = vrot.lane.b32.xlu0 %v275_v52, %s1100_s1 }
 0x19b   :  { %v528_v17 = vrot.slane %v525_v62, 7  ;;  %v708_v16 = vrot.slane %v706_v6, 4  ;;  %v709_v8 = vrot.slane %v706_v6, 5 }
 0x19d   :  { %v713_v15 = vadd.f32 %v709_v8, %v697_v7  ;;  %v530_v18 = vsel %vm529_vm10, %v528_v17, %v524_v5  ;;  %v712_v20 = vadd.f32 %v708_v16, %v696_v14 }
 0x19e   :  { %534 = vrot.lane.b32.xlu1 %v530_v18, %s1102_s21  ;;  %531 = vrot.lane.b32.xlu0 %v530_v18, %s1101_s20 }
 0x19f   :  { %v1311_v22 = vadd.f32 %v715_v13, %v713_v15  ;;  %v1316_v24 = vadd.f32 %v715_v13, %v712_v20 }
 0x1a1   :  { %v719_v23 = vmax.f32 %v1311_v22, 0.0  ;;  %v718_v26 = vmax.f32 %v1316_v24, 0.0 }
 0x1a2   :  { %547 = vrot.lane.b32.xlu1 %v530_v18, %s1099_s0  ;;  %544 = vrot.lane.b32.xlu0 %v530_v18, %s1100_s1 }
 0x1a3   :  { %v722_v25 = vrot.slane %v719_v23, 7 }
 0x1a5   :  { %v723_v28 = vsel %vm187_vm7, %v722_v25, %v718_v26 }
 0x1a6   :  { %560 = vrot.lane.b32.xlu1 %v530_v18, %s1103_s22  ;;  %557 = vrot.lane.b32.xlu0 %v530_v18, %s1104_s23 }
 0x1aa   :  { %727 = vrot.lane.b32.xlu1 %v723_v28, %s1102_s21  ;;  %724 = vrot.lane.b32.xlu0 %v723_v28, %s1101_s20 }
 0x1ae   :  { %740 = vrot.lane.b32.xlu1 %v723_v28, %s1099_s0  ;;  %737 = vrot.lane.b32.xlu0 %v723_v28, %s1100_s1 }
 0x1b2   :  { %753 = vrot.lane.b32.xlu1 %v723_v28, %s1103_s22  ;;  %750 = vrot.lane.b32.xlu0 %v723_v28, %s1104_s23 }
 0x1b6   :  { %766 = vrot.lane.b32.xlu1 %v723_v28, %s1105_s24  ;;  %763 = vrot.lane.b32.xlu0 %v723_v28, %s1106_s25 }
 0x204   :  { %v219_v30 = vpop.permute.xlu1 %218  ;;  %v216_v11 = vpop.permute.xlu0 %215 }
 0x205   :  { %v221_v31 = vsel %vm195_vm11, %v216_v11, %v219_v30 }
 0x206   :  { %v223_v32 = vrot.slane %v221_v31, 1  ;;  %v226_v38 = vmax.f32 %v208_v27, %v221_v31 }
 0x208   :  { %v227_v12 = vmax.f32 %v209_v21, %v223_v32  ;;  %v280_v35 = vpop.permute.xlu1 %279  ;;  %v277_v36 = vpop.permute.xlu0 %276 }
 0x209   :  { %v282_v37 = vsel %vm195_vm11, %v277_v36, %v280_v35 }
 0x20a   :  { %v387_v39 = vrot.slane %v227_v12, 7  ;;  %v284_v40 = vrot.slane %v282_v37, 1  ;;  %v287_v45 = vmax.f32 %v269_v44, %v282_v37  ;;  %v572_v44 = vld [vmem:[#allocation2 + $0x48] sm:$0xff] }
 0x20b   :  { %v997_v0 = vpack.c.bf16 %v572_v44, %v571_v29 }
 0x20c   :  { %v293_v46 = vpop.permute.xlu1 %292  ;;  %v290_v47 = vpop.permute.xlu0 %289  ;;  %v388_v9 = vsel %vm213_vm9, %v387_v39, %v226_v38  ;;  %v288_v10 = vmax.f32 %v270_v19, %v284_v40  ;;  %v573_v19 = vld [vmem:[#allocation2 + $0x50] sm:$0xff] }
 0x20d   :  { %v295_v21 = vsel %vm256_vm12, %v290_v47, %v293_v46  ;;  %960 = vmatmul.mubr.msk.f32.vlgmr.msra.gmra.mrb[4].mxu1 %vm312_vm15, %v388_v9  ;;  %v1000_v17 = vpack.c.bf16 %v574_v59, %v573_v19 }
 0x20e   :  { %v297_v27 = vrot.slane %v295_v21, 1  ;;  %v300_v48 = vmax.f32 %v287_v45, %v295_v21  ;;  %1004 = vmatpush3.bf16.msra.mxu1 %v1003_v41  ;;  %981 = vmatprep.mubr.msk.f32.mxu1 %vm1098_vm2, %v1096_v1 }
 0x20f   :  { %1005 = vmatprep.subr.bf16.mxu1 %v1107_v58 }
 0x210   :  { %v301_v50 = vmax.f32 %v288_v10, %v297_v27  ;;  %v535_v51 = vpop.permute.xlu1 %534  ;;  %v532_v52 = vpop.permute.xlu0 %531  ;;  %v309_v54 = vrot.slane %v300_v48, 2 }
 0x211   :  { %v537_v53 = vsel %vm195_vm11, %v532_v52, %v535_v51 }
 0x212   :  { %v310_v55 = vrot.slane %v301_v50, 1  ;;  %1007 = vmatpush3.bf16.msra.mxu1 %v1006_v49  ;;  %v539_v60 = vrot.slane %v537_v53, 1  ;;  %v542_v4 = vmax.f32 %v524_v5, %v537_v53  ;;  %v897_v50 = vld [vmem:[%s1393_s4] ss:$0 sm:$0xff] }
 0x214   :  { %v548_v61 = vpop.permute.xlu1 %547  ;;  %v545_v63 = vpop.permute.xlu0 %544  ;;  %v311_v2 = vsel %vm213_vm9, %v310_v55, %v309_v54  ;;  %v543_v7 = vmax.f32 %v525_v62, %v539_v60 }
 0x215   :  { %v550_v3 = vsel %vm256_vm12, %v545_v63, %v548_v61  ;;  %949 = vmatmul.mubr.msk.f32.vlgmr.msra.gmra.mrb[4].mxu0 %vm312_vm15, %v311_v2 }
 0x216   :  { %v552_v6 = vrot.slane %v550_v3, 1  ;;  %998 = vmatpush3.bf16.msra.mxu0 %v997_v0  ;;  %970 = vmatprep.mubr.msk.f32.mxu0 %vm1098_vm2, %v1096_v1  ;;  %v555_v16 = vmax.f32 %v542_v4, %v550_v3 }
 0x217   :  { %999 = vmatprep.subr.bf16.mxu0 %v1107_v58 }
 0x218   :  { %v561_v8 = vpop.permute.xlu1 %560  ;;  %v558_v13 = vpop.permute.xlu0 %557  ;;  %v556_v15 = vmax.f32 %v543_v7, %v552_v6 }
 0x219   :  { %v563_v14 = vsel %vm511_vm13, %v558_v13, %v561_v8 }
 0x21a   :  { %v565_v18 = vrot.slane %v563_v14, 1  ;;  %v568_v56 = vmax.f32 %v555_v16, %v563_v14  ;;  %1001 = vmatpush3.bf16.msra.mxu0 %v1000_v17 }
 0x21c   :  { %v569_v5 = vmax.f32 %v556_v15, %v565_v18  ;;  %v728_v20 = vpop.permute.xlu1 %727  ;;  %v725_v25 = vpop.permute.xlu0 %724  ;;  %v577_v28 = vrot.slane %v568_v56, 5 }
 0x21d   :  { %v730_v1 = vsel %vm195_vm11, %v725_v25, %v728_v20 }
 0x21e   :  { %v578_v30 = vrot.slane %v569_v5, 4  ;;  %v732_v31 = vrot.slane %v730_v1, 1  ;;  %v735_v32 = vmax.f32 %v718_v26, %v730_v1 }
 0x220   :  { %v741_v58 = vpop.permute.xlu1 %740  ;;  %v738_v11 = vpop.permute.xlu0 %737  ;;  %v579_v57 = vsel %vm213_vm9, %v578_v30, %v577_v28  ;;  %v736_v36 = vmax.f32 %v719_v23, %v732_v31 }
 0x221   :  { %v743_v62 = vsel %vm256_vm12, %v738_v11, %v741_v58  ;;  %971 = vmatmul.mubr.msk.f32.vlgmr.msra.gmra.mrb[6].mxu0 %vm312_vm15, %v579_v57 }
 0x222   :  { %v745_v33 = vrot.slane %v743_v62, 1  ;;  %v748_v37 = vmax.f32 %v735_v32, %v743_v62 }
 0x224   :  { %v754_v34 = vpop.permute.xlu1 %753  ;;  %v751_v12 = vpop.permute.xlu0 %750  ;;  %v749_v39 = vmax.f32 %v736_v36, %v745_v33 }
 0x225   :  { %v756_v35 = vsel %vm511_vm13, %v751_v12, %v754_v34 }
 0x226   :  { %v758_v38 = vrot.slane %v756_v35, 1  ;;  %v761_v40 = vmax.f32 %v748_v37, %v756_v35 }
 0x228   :  { %v767_v41 = vpop.permute.xlu1 %766  ;;  %v764_v42 = vpop.permute.xlu0 %763  ;;  %v762_v45 = vmax.f32 %v749_v39, %v758_v38 }
 0x229   :  { %v769_v43 = vsel %vm705_vm14, %v764_v42, %v767_v41 }
 0x22a   :  { %v771_v46 = vrot.slane %v769_v43, 1  ;;  %v774_v24 = vmax.f32 %v761_v40, %v769_v43 }
 0x22c   :  { %v775_v26 = vmax.f32 %v762_v45, %v771_v46  ;;  %v783_v47 = vrot.slane %v774_v24, 1 }
 0x22e   :  { %v784_v9 = vsel %vm213_vm9, %v775_v26, %v783_v47 }
 0x22f   :  { %982 = vmatmul.mubr.msk.f32.vlgmr.msra.gmra.mrb[6].mxu1 %vm312_vm15, %v784_v9 }
 0x2e0   :  { %v457_v21 = vpop.f32.mrb[4].mxu1 }
 0x2e1   :  { %v961_v22 = vpop.f32.mrb[5].mxu1 }
 0x2e8   :  { %v381_v23 = vpop.f32.mrb[4].mxu0 }
 0x2e9   :  { %v458_v10 = vadd.f32 %v457_v21, %v381_v23  ;;  %v950_v27 = vpop.f32.mrb[5].mxu0 }
 0x2f4   :  { %v648_v48 = vpop.f32.mrb[6].mxu0 }
 0x2f5   :  { %v652_v49 = vadd.f32 %v648_v48, %v458_v10  ;;  %v972_v29 = vpop.f32.mrb[7].mxu0 }
 0x302   :  { %v853_v44 = vpop.f32.mrb[6].mxu1 }
 0x303   :  { %v857_v51 = vadd.f32 %v853_v44, %v652_v49  ;;  %v983_v52 = vpop.f32.mrb[7].mxu1 }
 0x305   :  { %v865_v53 = vadd.f32 %v897_v50, %v857_v51 }
 0x307   :  { %866 = vst [vmem:[#allocation7] sm:$0x3] %v865_v53 }
 0x308   :  { %1075 = shalt.err (!%p1072_p3)
}
 0x309   :  { %s1076_s11 = scalar_lea.hbm %s1394_s5, 32 }
 0x30a   :  { %p1077_p4 = scmp.ne.s32.totalorder %s1394_s5, %s1076_s11  ;;  %p1080_p5 = scmp.lt.u32.totalorder %s1076_s11, %s1394_s5 }
 0x30c   :  { %p1082_p6 = pnand %p1080_p5, %p1077_p4 }
 0x30e   :  { %1085 = shalt.err (!%p1082_p6)
}
 0x30f   :  { %876 = dma.vmem_to_hbm [thread:$0]  %s874_s7, 32, %s1394_s5, [#allocation4]  }
 0x310   :  { %1090 = dma.done.wait [#allocation4], 32  }
 0x311   :  { %1091 = vsyncadd [#allocation4], 4294967264 }
 0x312   :  { %880 = vsyncpa [#allocation3], 1 }
 0x313   :  { %881 = vsyncpa [#allocation4], 1 }
 0x314   :  { %882 = vsyncpa [#allocation5], 1 }

</bundles_post_ra>
